<compile_context>
chip_gen: v7x
topology: tpu7x:2x2x1
jax: 0.10.0
libtpu: 0.0.40
codegen_flags: <defaults>
</compile_context>

<pallas_src>
import functools

import jax
import jax.numpy as jnp
from jax import lax
from jax.experimental import pallas as pl
from jax.experimental.pallas import tpu as pltpu

BN_EPS = 1e-5
_LANE = 128


def _vmem_limit_bytes():
    """Per-generation scoped-VMEM limit: 3/4 of physical, capped at 100 MiB.

    v5e/v6e (128 MiB physical) -> 96 MiB, v7x (64 MiB physical) -> 48 MiB.
    Falls back to a conservative 48 MiB if the query is unavailable.
    """
    try:
        cap = int(pltpu.get_tpu_info().vmem_capacity_bytes)
        if cap <= 0:
            raise ValueError
    except Exception:  # pragma: no cover - conservative fallback
        return 48 * 1024 * 1024
    return int(min(100 * 1024 * 1024, cap * 3 // 4))


_VMEM_LIMIT = _vmem_limit_bytes()


# ----------------------------------------------------------------------------
# Pass 1: conv matmul + resident BatchNorm partial statistics.
# ----------------------------------------------------------------------------
def conv_stats_kernel(w_ref, p_ref, y_ref, psum_ref, pssq_ref):
    """One pixel tile: y = W @ P on the MXU (f32 accumulate) plus resident
    per-channel sum / sum-of-squares accumulators (two-pass BatchNorm).

    w_ref    : (Cout, K)           weights, resident across the whole grid
    p_ref    : (1, K, tile_hw)     im2col patch tile (lane-dense minor dim)
    y_ref    : (1, Cout, tile_hw)  conv output tile (lane-dense stores)
    psum_ref : (1, Cout, 128)      resident accumulator, one row per core split
    pssq_ref : (1, Cout, 128)      resident accumulator
    """
    first = (pl.program_id(1) == 0) & (pl.program_id(2) == 0)

    @pl.when(first)
    def _():
        psum_ref[...] = jnp.zeros_like(psum_ref)
        pssq_ref[...] = jnp.zeros_like(pssq_ref)

    y = jnp.dot(w_ref[...], p_ref[0], preferred_element_type=jnp.float32)
    y_ref[0] = y.astype(y_ref.dtype)
    # (Cout, 1) partials broadcast over the 128-lane accumulator row.
    psum_ref[...] += jnp.sum(y, axis=1, keepdims=True)[None]
    pssq_ref[...] += jnp.sum(y * y, axis=1, keepdims=True)[None]


# ----------------------------------------------------------------------------
# Pass 2: fused normalize + affine + ReLU.
# ----------------------------------------------------------------------------
def bn_relu_kernel(scale_ref, shift_ref, y_ref, o_ref):
    """out = relu(y * scale + shift) on one lane-dense pixel tile.

    scale_ref/shift_ref: (Cout, 128) lane-dense, resident (value repeated
    across lanes host-side; column 0 is used).
    """
    y = y_ref[0].astype(jnp.float32)
    scale = scale_ref[:, 0:1]
    shift = shift_ref[:, 0:1]
    o_ref[0] = jnp.maximum(y * scale + shift, 0.0).astype(o_ref.dtype)


def _im2col_per_image(x, kh, kw, stride, padding):
    """x: (B, Cin, H, W) -> per-image channel-major patches (B, K, Hout*Wout).

    K = Cin*kh*kw (matches OIHW weight flattening).
    """
    B, Cin, H, W = x.shape
    Hout = (H + 2 * padding - kh) // stride + 1
    Wout = (W + 2 * padding - kw) // stride + 1
    xp = jnp.pad(x, ((0, 0), (0, 0), (padding, padding), (padding, padding)))
    cols = []
    for i in range(kh):
        for j in range(kw):
            cols.append(
                xp[:, :,
                   i:i + (Hout - 1) * stride + 1:stride,
                   j:j + (Wout - 1) * stride + 1:stride])
    # (kh*kw, B, Cin, Hout, Wout) -> (B, Cin, kh*kw, Hout, Wout) -> (B, K, HW)
    pt = jnp.stack(cols, axis=0).transpose(1, 2, 0, 3, 4)
    pt = pt.reshape(B, Cin * kh * kw, Hout * Wout)
    return pt, Hout, Wout


def _round_up(v, m):
    return ((v + m - 1) // m) * m


def _pick_pass2_tile(tile1, num_tiles1, target):
    """Largest multiple of the pass-1 tile that divides HWp and is <= target."""
    kmax = max(1, min(num_tiles1, target // max(tile1, 1)))
    for k in range(kmax, 0, -1):
        if num_tiles1 % k == 0:
            return tile1 * k
    return tile1


@functools.partial(
    jax.jit,
    static_argnames=("stride", "padding", "tile_hw", "tile_hw_bn",
                     "compute_dtype"))
def conv_block_forward(x, weight, gamma, beta, *, stride=1, padding=0,
                       tile_hw=2048, tile_hw_bn=4096,
                       compute_dtype=jnp.bfloat16):
    """ConvBlock.forward with mode='conv', use_bn=True (no conv bias).

    x:      (B, Cin, H, W)       float32, NCHW (PyTorch convention)
    weight: (Cout, Cin, kh, kw)  float32, OIHW (PyTorch convention)
    gamma, beta: (Cout,)         BatchNorm2d affine parameters
    Returns (B, Cout, Hout, Wout) float32.  BatchNorm uses training-mode batch
    statistics (biased variance), like torch.nn.BatchNorm2d in train().
    """
    B, Cin, H, W = x.shape
    Cout, Cin_w, kh, kw = weight.shape
    assert Cin_w == Cin
    K = Cin * kh * kw

    pt, Hout, Wout = _im2col_per_image(x, kh, kw, stride, padding)
    HW = Hout * Wout          # true pixels per image
    N = B * HW                # true pixels per batch

    # Lane-align the per-image pixel axis and pad it to a whole number of
    # tiles.  Zero-padded columns produce y == 0 (there is NO conv bias when
    # use_bn=True), so they contribute nothing to the batch statistics.
    tile_hw = max(_LANE, min(_round_up(tile_hw, _LANE), _round_up(HW, _LANE)))
    num_tiles = (HW + tile_hw - 1) // tile_hw
    HWp = num_tiles * tile_hw
    pt = jnp.pad(pt, ((0, 0), (0, 0), (0, HWp - HW))).astype(compute_dtype)
    w2 = weight.reshape(Cout, K).astype(compute_dtype)

    # Optional 2-way split of the pixel-tile axis so v7x's two TensorCores can
    # each own a private resident stats row (leading "parallel" grid axis).
    nc = 2 if (num_tiles >= 2 and num_tiles % 2 == 0) else 1
    tiles_per_core = num_tiles // nc

    itemsize = jnp.dtype(compute_dtype).itemsize
    cost1 = pl.CostEstimate(
        flops=2 * B * HWp * K * Cout,
        transcendentals=0,
        bytes_accessed=(B * K * HWp + Cout * K + B * Cout * HWp) * itemsize
        + 2 * nc * Cout * _LANE * 4)

    # ---- Pass 1: tiled conv matmul + resident BatchNorm partial statistics.
    y_t, psum, pssq = pl.pallas_call(
        conv_stats_kernel,
        out_shape=(
            jax.ShapeDtypeStruct((B, Cout, HWp), compute_dtype),
            jax.ShapeDtypeStruct((nc, Cout, _LANE), jnp.float32),
            jax.ShapeDtypeStruct((nc, Cout, _LANE), jnp.float32),
        ),
        grid=(nc, B, tiles_per_core),
        in_specs=[
            pl.BlockSpec((Cout, K), lambda c, b, t: (0, 0)),        # resident
            pl.BlockSpec((1, K, tile_hw),
                         lambda c, b, t: (b, 0, c * tiles_per_core + t)),
        ],
        out_specs=(
            pl.BlockSpec((1, Cout, tile_hw),
                         lambda c, b, t: (b, 0, c * tiles_per_core + t)),
            pl.BlockSpec((1, Cout, _LANE), lambda c, b, t: (c, 0, 0)),  # acc
            pl.BlockSpec((1, Cout, _LANE), lambda c, b, t: (c, 0, 0)),  # acc
        ),
        compiler_params=pltpu.CompilerParams(
            dimension_semantics=("parallel", "arbitrary", "arbitrary"),
            vmem_limit_bytes=_VMEM_LIMIT),
        cost_estimate=cost1,
    )(w2, pt)

    # Tiny finalize: exact biased mean/var over the TRUE pixel count.
    cnt = jnp.float32(N)
    s = jnp.sum(psum[:, :, 0], axis=0)      # (Cout,) all lanes carry same value
    ss = jnp.sum(pssq[:, :, 0], axis=0)
    mean = s / cnt
    var = jnp.maximum(ss / cnt - mean * mean, 0.0)
    inv = lax.rsqrt(var + BN_EPS)
    scale = (gamma * inv).astype(jnp.float32)
    shift = (beta - mean * gamma * inv).astype(jnp.float32)
    # Pre-broadcast host-side to lane-dense (Cout, 128) blocks for pass 2.
    scale_b = jnp.broadcast_to(scale[:, None], (Cout, _LANE))
    shift_b = jnp.broadcast_to(shift[:, None], (Cout, _LANE))

    # Pass-2 tile decoupled from pass 1 (its VMEM footprint is tiny).
    tile_bn = _pick_pass2_tile(tile_hw, num_tiles, _round_up(tile_hw_bn, _LANE))
    bn_tiles = HWp // tile_bn

    cost2 = pl.CostEstimate(
        flops=3 * B * Cout * HWp,
        transcendentals=0,
        bytes_accessed=B * Cout * HWp * (itemsize + 4) + 2 * Cout * _LANE * 4)

    # ---- Pass 2: fused normalize + affine + ReLU, lane-dense loads/stores.
    # Output stays f32 to match the PyTorch module's dtype.
    out_t = pl.pallas_call(
        bn_relu_kernel,
        out_shape=jax.ShapeDtypeStruct((B, Cout, HWp), jnp.float32),
        grid=(B, bn_tiles),
        in_specs=[
            pl.BlockSpec((Cout, _LANE), lambda b, t: (0, 0)),
            pl.BlockSpec((Cout, _LANE), lambda b, t: (0, 0)),
            pl.BlockSpec((1, Cout, tile_bn), lambda b, t: (b, 0, t)),
        ],
        out_specs=pl.BlockSpec((1, Cout, tile_bn), lambda b, t: (b, 0, t)),
        compiler_params=pltpu.CompilerParams(
            dimension_semantics=("parallel", "parallel"),
            vmem_limit_bytes=_VMEM_LIMIT),
        cost_estimate=cost2,
    )(scale_b, shift_b, y_t)

    # Per-image channel-major layout: NCHW is just a reshape (plus a tail trim
    # only when Hout*Wout is not lane-aligned).  No full transpose pass.
    if HWp != HW:
        out_t = out_t[:, :, :HW]
    return out_t.reshape(B, Cout, Hout, Wout)


def reference_forward(x, weight, gamma, beta, *, stride=1, padding=0):
    """Pure-JAX reference: conv2d -> training-mode BN -> ReLU."""
    y = lax.conv_general_dilated(
        x, weight,
        window_strides=(stride, stride),
        padding=[(padding, padding), (padding, padding)],
        dimension_numbers=("NCHW", "OIHW", "NCHW"))
    mean = jnp.mean(y, axis=(0, 2, 3), keepdims=True)
    var = jnp.mean((y - mean) ** 2, axis=(0, 2, 3), keepdims=True)
    g = gamma.reshape(1, -1, 1, 1)
    b = beta.reshape(1, -1, 1, 1)
    return jnp.maximum((y - mean) * lax.rsqrt(var + BN_EPS) * g + b, 0.0)


if __name__ == "__main__":
    key = jax.random.PRNGKey(0)
    k_x, k_w = jax.random.split(key)

    # ConvBlock(in_planes=4, out_planes=8, kernel_size=3, stride=1, padding=1,
    #           mode='conv', use_bn=True)
    B, Cin, H, W = 2, 4, 16, 16
    Cout, kh, kw = 8, 3, 3
    stride, padding = 1, 1

    x = jax.random.normal(k_x, (B, Cin, H, W), dtype=jnp.float32)
    weight = jax.random.normal(k_w, (Cout, Cin, kh, kw), dtype=jnp.float32) * 0.1
    gamma = jnp.ones((Cout,), dtype=jnp.float32)   # BatchNorm2d default init
    beta = jnp.zeros((Cout,), dtype=jnp.float32)

    ref = reference_forward(x, weight, gamma, beta, stride=stride,
                            padding=padding)

    # f32 strict check.  tile_hw=128 here ONLY to exercise the multi-tile /
    # split-accumulator path at this toy spatial size (production default is
    # the large lane-dense tile below).
    out_f32 = conv_block_forward(
        x, weight, gamma, beta, stride=stride, padding=padding,
        tile_hw=128, compute_dtype=jnp.float32)
    out_f32 = jax.block_until_ready(out_f32)
    assert out_f32.shape == (B, Cout, H, W), out_f32.shape
    assert jnp.allclose(out_f32, ref, atol=1e-3, rtol=1e-3), \
        float(jnp.max(jnp.abs(out_f32 - ref)))

    # bf16 MXU operands (default fast path), f32 accumulation / BN statistics.
    out_bf16 = conv_block_forward(
        x, weight, gamma, beta, stride=stride, padding=padding)
    out_bf16 = jax.block_until_ready(out_bf16)
    assert out_bf16.shape == (B, Cout, H, W), out_bf16.shape
    assert jnp.allclose(out_bf16, ref, atol=5e-2, rtol=5e-2), \
        float(jnp.max(jnp.abs(out_bf16 - ref)))

    print("KERNEL_OK")
</pallas_src>

<mosaic_0001>
module attributes {stable_mosaic.version = 11 : i64} {
  func.func @conv_stats_kernel(%arg0: i32, %arg1: i32, %arg2: i32, %arg3: memref<8x36xf32, #tpu.memory_space<vmem>>, %arg4: memref<1x36x128xf32, #tpu.memory_space<vmem>>, %arg5: memref<1x8x128xf32, #tpu.memory_space<vmem>>, %arg6: memref<1x8x128xf32, #tpu.memory_space<vmem>>, %arg7: memref<1x8x128xf32, #tpu.memory_space<vmem>>) attributes {dimension_semantics = [#tpu.dimension_semantics<parallel>, #tpu.dimension_semantics<arbitrary>, #tpu.dimension_semantics<arbitrary>], iteration_bounds = array<i64: 2, 2, 1>, scalar_prefetch = 0 : i64, scratch_operands = 0 : i64, tpu.core_type = #tpu.core_type<tc>, window_params = [{pipeline_mode = #tpu.pipeline_mode<synchronous>, transform_indices = @transform_0, window_bounds = array<i64: 8, 36>}, {transform_indices = @transform_1, window_bounds = array<i64: 1, 36, 128>}, {transform_indices = @transform_2, window_bounds = array<i64: 1, 8, 128>}, {transform_indices = @transform_3, window_bounds = array<i64: 1, 8, 128>}, {transform_indices = @transform_4, window_bounds = array<i64: 1, 8, 128>}]} {
    %c0_i32 = arith.constant 0 : i32
    %0 = arith.cmpi eq, %arg1, %c0_i32 : i32
    %c0_i32_0 = arith.constant 0 : i32
    %1 = arith.cmpi eq, %arg2, %c0_i32_0 : i32
    %2 = arith.andi %0, %1 : i1
    %3 = arith.extui %2 : i1 to i32
    %c0_i32_1 = arith.constant 0 : i32
    %4 = arith.cmpi ne, %3, %c0_i32_1 : i32
    scf.if %4 {
      %cst_23 = arith.constant 0.000000e+00 : f32
      %27 = vector.broadcast %cst_23 : f32 to vector<1x8x128xf32>
      %c0_24 = arith.constant 0 : index
      %c0_25 = arith.constant 0 : index
      %c0_26 = arith.constant 0 : index
      %28 = vector.load %arg6[%c0_24, %c0_25, %c0_26] : memref<1x8x128xf32, #tpu.memory_space<vmem>>, vector<1x8x128xf32>
      tpu.vector_store %arg6[%c0_24, %c0_25, %c0_26], %27 {strides = array<i32>} : memref<1x8x128xf32, #tpu.memory_space<vmem>>, vector<1x8x128xf32>,
      %cst_27 = arith.constant 0.000000e+00 : f32
      %29 = vector.broadcast %cst_27 : f32 to vector<1x8x128xf32>
      %c0_28 = arith.constant 0 : index
      %c0_29 = arith.constant 0 : index
      %c0_30 = arith.constant 0 : index
      %30 = vector.load %arg7[%c0_28, %c0_29, %c0_30] : memref<1x8x128xf32, #tpu.memory_space<vmem>>, vector<1x8x128xf32>
      tpu.vector_store %arg7[%c0_28, %c0_29, %c0_30], %29 {strides = array<i32>} : memref<1x8x128xf32, #tpu.memory_space<vmem>>, vector<1x8x128xf32>,
    } else {
    }
    %c0 = arith.constant 0 : index
    %c0_2 = arith.constant 0 : index
    %5 = vector.load %arg3[%c0, %c0_2] : memref<8x36xf32, #tpu.memory_space<vmem>>, vector<8x36xf32>
    %c0_3 = arith.constant 0 : index
    %c0_4 = arith.constant 0 : index
    %c0_5 = arith.constant 0 : index
    %6 = vector.load %arg4[%c0_3, %c0_4, %c0_5] : memref<1x36x128xf32, #tpu.memory_space<vmem>>, vector<1x36x128xf32>
    %7 = vector.shape_cast %6 : vector<1x36x128xf32> to vector<36x128xf32>
    %cst = arith.constant dense<0.000000e+00> : vector<8x128xf32>
    %8 = tpu.matmul %5, %7, %cst {dimension_numbers = #tpu.dot_dimension_numbers<[1], [0], [0], [1], [0, 0, 1, 1], [], []>} : vector<8x36xf32>, vector<36x128xf32>, vector<8x128xf32> -> vector<8x128xf32>
    %c0_6 = arith.constant 0 : index
    %c0_7 = arith.constant 0 : index
    %c0_8 = arith.constant 0 : index
    %9 = vector.load %arg5[%c0_6, %c0_7, %c0_8] : memref<1x8x128xf32, #tpu.memory_space<vmem>>, vector<1x8x128xf32>
    %10 = vector.shape_cast %9 : vector<1x8x128xf32> to vector<8x128xf32>
    %11 = vector.shape_cast %8 : vector<8x128xf32> to vector<1x8x128xf32>
    tpu.vector_store %arg5[%c0_6, %c0_7, %c0_8], %11 {strides = array<i32>} : memref<1x8x128xf32, #tpu.memory_space<vmem>>, vector<1x8x128xf32>,
    %c0_9 = arith.constant 0 : index
    %c0_10 = arith.constant 0 : index
    %c0_11 = arith.constant 0 : index
    %12 = vector.load %arg6[%c0_9, %c0_10, %c0_11] : memref<1x8x128xf32, #tpu.memory_space<vmem>>, vector<1x8x128xf32>
    %cst_12 = arith.constant dense<0.000000e+00> : vector<8xf32>
    %13 = vector.multi_reduction <add>, %8, %cst_12 [1] : vector<8x128xf32> to vector<8xf32>
    %14 = vector.shape_cast %13 : vector<8xf32> to vector<8x1xf32>
    %15 = vector.shape_cast %14 : vector<8x1xf32> to vector<1x8x1xf32>
    %16 = vector.broadcast %15 : vector<1x8x1xf32> to vector<1x8x128xf32>
    %17 = arith.addf %12, %16 : vector<1x8x128xf32>
    %c0_13 = arith.constant 0 : index
    %c0_14 = arith.constant 0 : index
    %c0_15 = arith.constant 0 : index
    %18 = vector.load %arg6[%c0_13, %c0_14, %c0_15] : memref<1x8x128xf32, #tpu.memory_space<vmem>>, vector<1x8x128xf32>
    tpu.vector_store %arg6[%c0_13, %c0_14, %c0_15], %17 {strides = array<i32>} : memref<1x8x128xf32, #tpu.memory_space<vmem>>, vector<1x8x128xf32>,
    %c0_16 = arith.constant 0 : index
    %c0_17 = arith.constant 0 : index
    %c0_18 = arith.constant 0 : index
    %19 = vector.load %arg7[%c0_16, %c0_17, %c0_18] : memref<1x8x128xf32, #tpu.memory_space<vmem>>, vector<1x8x128xf32>
    %20 = arith.mulf %8, %8 : vector<8x128xf32>
    %cst_19 = arith.constant dense<0.000000e+00> : vector<8xf32>
    %21 = vector.multi_reduction <add>, %20, %cst_19 [1] : vector<8x128xf32> to vector<8xf32>
    %22 = vector.shape_cast %21 : vector<8xf32> to vector<8x1xf32>
    %23 = vector.shape_cast %22 : vector<8x1xf32> to vector<1x8x1xf32>
    %24 = vector.broadcast %23 : vector<1x8x1xf32> to vector<1x8x128xf32>
    %25 = arith.addf %19, %24 : vector<1x8x128xf32>
    %c0_20 = arith.constant 0 : index
    %c0_21 = arith.constant 0 : index
    %c0_22 = arith.constant 0 : index
    %26 = vector.load %arg7[%c0_20, %c0_21, %c0_22] : memref<1x8x128xf32, #tpu.memory_space<vmem>>, vector<1x8x128xf32>
    tpu.vector_store %arg7[%c0_20, %c0_21, %c0_22], %25 {strides = array<i32>} : memref<1x8x128xf32, #tpu.memory_space<vmem>>, vector<1x8x128xf32>,
    return
  }
  func.func @transform_0(%arg0: i32, %arg1: i32, %arg2: i32) -> (i32, i32) {
    %c0_i32 = arith.constant 0 : i32
    %c0_i32_0 = arith.constant 0 : i32
    %c0_i32_1 = arith.constant 0 : i32
    return %c0_i32, %c0_i32_0 : i32, i32
  }
  func.func @transform_1(%arg0: i32, %arg1: i32, %arg2: i32) -> (i32, i32, i32) {
    %c1_i32 = arith.constant 1 : i32
    %0 = arith.muli %arg0, %c1_i32 : i32
    %1 = arith.addi %0, %arg2 : i32
    %c0_i32 = arith.constant 0 : i32
    %c0_i32_0 = arith.constant 0 : i32
    return %arg1, %c0_i32, %1 : i32, i32, i32
  }
  func.func @transform_2(%arg0: i32, %arg1: i32, %arg2: i32) -> (i32, i32, i32) {
    %c1_i32 = arith.constant 1 : i32
    %0 = arith.muli %arg0, %c1_i32 : i32
    %1 = arith.addi %0, %arg2 : i32
    %c0_i32 = arith.constant 0 : i32
    %c0_i32_0 = arith.constant 0 : i32
    return %arg1, %c0_i32, %1 : i32, i32, i32
  }
  func.func @transform_3(%arg0: i32, %arg1: i32, %arg2: i32) -> (i32, i32, i32) {
    %c0_i32 = arith.constant 0 : i32
    %c0_i32_0 = arith.constant 0 : i32
    %c0_i32_1 = arith.constant 0 : i32
    return %arg0, %c0_i32, %c0_i32_0 : i32, i32, i32
  }
  func.func @transform_4(%arg0: i32, %arg1: i32, %arg2: i32) -> (i32, i32, i32) {
    %c0_i32 = arith.constant 0 : i32
    %c0_i32_0 = arith.constant 0 : i32
    %c0_i32_1 = arith.constant 0 : i32
    return %arg0, %c0_i32, %c0_i32_0 : i32, i32, i32
  }
}

module attributes {stable_mosaic.version = 11 : i64} {
  func.func @bn_relu_kernel(%arg0: i32, %arg1: i32, %arg2: memref<8x128xf32, #tpu.memory_space<vmem>>, %arg3: memref<8x128xf32, #tpu.memory_space<vmem>>, %arg4: memref<1x8x256xf32, #tpu.memory_space<vmem>>, %arg5: memref<1x8x256xf32, #tpu.memory_space<vmem>>) attributes {dimension_semantics = [#tpu.dimension_semantics<parallel>, #tpu.dimension_semantics<parallel>], iteration_bounds = array<i64: 2, 1>, scalar_prefetch = 0 : i64, scratch_operands = 0 : i64, tpu.core_type = #tpu.core_type<tc>, window_params = [{pipeline_mode = #tpu.pipeline_mode<synchronous>, transform_indices = @transform_0, window_bounds = array<i64: 8, 128>}, {pipeline_mode = #tpu.pipeline_mode<synchronous>, transform_indices = @transform_1, window_bounds = array<i64: 8, 128>}, {transform_indices = @transform_2, window_bounds = array<i64: 1, 8, 256>}, {transform_indices = @transform_3, window_bounds = array<i64: 1, 8, 256>}]} {
    %c0 = arith.constant 0 : index
    %c0_0 = arith.constant 0 : index
    %c0_1 = arith.constant 0 : index
    %0 = vector.load %arg4[%c0, %c0_0, %c0_1] : memref<1x8x256xf32, #tpu.memory_space<vmem>>, vector<1x8x256xf32>
    %1 = vector.shape_cast %0 : vector<1x8x256xf32> to vector<8x256xf32>
    %c0_2 = arith.constant 0 : index
    %c0_3 = arith.constant 0 : index
    %2 = vector.load %arg2[%c0_2, %c0_3] : memref<8x128xf32, #tpu.memory_space<vmem>>, vector<8x1xf32>
    %c0_4 = arith.constant 0 : index
    %c0_5 = arith.constant 0 : index
    %3 = vector.load %arg3[%c0_4, %c0_5] : memref<8x128xf32, #tpu.memory_space<vmem>>, vector<8x1xf32>
    %4 = vector.broadcast %2 : vector<8x1xf32> to vector<8x256xf32>
    %5 = arith.mulf %1, %4 : vector<8x256xf32>
    %6 = vector.broadcast %3 : vector<8x1xf32> to vector<8x256xf32>
    %7 = arith.addf %5, %6 : vector<8x256xf32>
    %cst = arith.constant 0.000000e+00 : f32
    %8 = vector.broadcast %cst : f32 to vector<8x256xf32>
    %9 = arith.maximumf %7, %8 : vector<8x256xf32>
    %c0_6 = arith.constant 0 : index
    %c0_7 = arith.constant 0 : index
    %c0_8 = arith.constant 0 : index
    %10 = vector.load %arg5[%c0_6, %c0_7, %c0_8] : memref<1x8x256xf32, #tpu.memory_space<vmem>>, vector<1x8x256xf32>
    %11 = vector.shape_cast %10 : vector<1x8x256xf32> to vector<8x256xf32>
    %12 = vector.shape_cast %9 : vector<8x256xf32> to vector<1x8x256xf32>
    tpu.vector_store %arg5[%c0_6, %c0_7, %c0_8], %12 {strides = array<i32>} : memref<1x8x256xf32, #tpu.memory_space<vmem>>, vector<1x8x256xf32>,
    return
  }
  func.func @transform_0(%arg0: i32, %arg1: i32) -> (i32, i32) {
    %c0_i32 = arith.constant 0 : i32
    %c0_i32_0 = arith.constant 0 : i32
    %c0_i32_1 = arith.constant 0 : i32
    return %c0_i32, %c0_i32_0 : i32, i32
  }
  func.func @transform_1(%arg0: i32, %arg1: i32) -> (i32, i32) {
    %c0_i32 = arith.constant 0 : i32
    %c0_i32_0 = arith.constant 0 : i32
    %c0_i32_1 = arith.constant 0 : i32
    return %c0_i32, %c0_i32_0 : i32, i32
  }
  func.func @transform_2(%arg0: i32, %arg1: i32) -> (i32, i32, i32) {
    %c0_i32 = arith.constant 0 : i32
    %c0_i32_0 = arith.constant 0 : i32
    return %arg0, %c0_i32, %arg1 : i32, i32, i32
  }
  func.func @transform_3(%arg0: i32, %arg1: i32) -> (i32, i32, i32) {
    %c0_i32 = arith.constant 0 : i32
    %c0_i32_0 = arith.constant 0 : i32
    return %arg0, %c0_i32, %arg1 : i32, i32, i32
  }
}

</mosaic_0001>

<bundles_post_ra>
// kernel: conv_block_forward.2
= control target key start
LH: loop header
LB: loop body
LE: loop exit
PB: predicated region body
PF: predicated region fallthrough
CT: control target
= control target key end

     0   :  { %s760_s15 = smov 0   ;;  %s762_s16 = smov 0   ;;  %s871_s0 = inlined_call_operand.vmem [shape: f32[8,36], index: 0, kind: input, shape index: {}]   ;;  %s872_s1 = inlined_call_operand.vmem [shape: f32[2,36,256], index: 1, kind: input, shape index: {}]   ;;  %s873_s2 = inlined_call_operand.vmem [shape: f32[2,8,256], index: 2, kind: output, shape index: {0}]   ;;  %s874_s3 = inlined_call_operand.vmem [shape: f32[2,8,128], index: 3, kind: output, shape index: {1}]   ;;  %s875_s4 = inlined_call_operand.vmem [shape: f32[2,8,128], index: 4, kind: output, shape index: {2}]  }
   0x1   :  { %s764_s17 = smov 0   ;;  %s766_s18 = smov 0  }
   0x2   :  { %s768_s19 = smov 0   ;;  %s770_s20 = smov 0  }
   0x3   :  { %s772_s21 = smov 0  }
   0x4 LB: > { %s30_s22 = sadd.s32 1, %s721_s19  ;;  %s34_s23 = sadd.s32 1, %s725_s20  ;;  %s729_s21 = sphi %s772_s21, %s15_s21   ;;  %s725_s20 = sphi %s770_s20, %s881_s20   ;;  %s721_s19 = sphi %s768_s19, %s880_s19   ;;  %s717_s18 = sphi %s766_s18, %s879_s18   ;;  %s713_s17 = sphi %s764_s17, %s878_s17   ;;  %s709_s16 = sphi %s762_s16, %s877_s16   ;;  %s705_s15 = sphi %s760_s15, %s876_s15  }
   0x5   : > { %p32_p0 = scmp.ge.s32.totalorder %s30_s22, 2  ;;  %p73_p1 = scmp.ne.s32.totalorder %s709_s16, %s705_s15 }
   0x6   : > { %p74_p2 = scmp.eq.s32.totalorder %s729_s21, 0  ;;  %s66_s27 = sadd.s32 1, %s709_s16 }
   0x7   : > { %s883_s22 = smov (%p32_p0, %s30_s22), 0  ;;  %s885_s23 = smov (!%p32_p0, %s34_s23), %s725_s20 }
   0x8   : > { %p75_p3 = por %p74_p2, %p73_p1  ;;  %p36_p4 = scmp.ge.s32.totalorder %s885_s23, 2 }
   0x9   : > { %s61_s24 = ssub.s32 %s721_s19, %s883_s22  ;;  %p574_p6 = scmp.ge.s32.totalorder %s729_s21, 4 }
   0xa   : > { %s887_s23 = smov (%p36_p4, %s885_s23), 0 }
   0xb   : > { %s62_s25 = ssub.s32 %s725_s20, %s887_s23  ;;  %184 = sbr.rel (%p574_p6) target bundleno = 28 (0x1c), region = 20 }
   0xc   : > { %s63_s26 = sor.u32 %s62_s25, %s61_s24 }
   0xd   : > { %p64_p5 = scmp.eq.s32.totalorder %s63_s26, 0 }
   0xf   : > { %s811_s28 = scalar_select %p64_p5, %s709_s16, %s66_s27  }
  0x12   : > { %187 = sbr.rel (!%p75_p3) target bundleno = 28 (0x1c), region = 24  ;;  %s189_s29 = sand.u32 (%p75_p3), 1, %s709_s16  }
  0x13   : > { %s613_s30 = smul.u32 (%p75_p3), 10, %s721_s19 }
  0x14   : > { %s612_s5 = smul.u32 (%p75_p3), 40, %s189_s29 }
  0x15   : > { %s194_s6 = sadd.s32 (%p75_p3), %s725_s20, %s613_s30 }
  0x16   : > { %s575_s7 = sshll.u32 (%p75_p3), %s194_s6, 3  ;;  %s191_s11 = scalar_lea.vmem (%p75_p3), [#allocation2], %s612_s5 }
  0x17   : > { %s196_s10 = scalar_lea.vmem (%p75_p3), %s872_s1, %s575_s7 }
  0x18   : > { %v232_v0 = vld [vmem:[%s196_s10] sm:$0xff] (%p75_p3)  ;;  %v234_v1 = vld [vmem:[%s196_s10 + $0x10] sm:$0xff] (%p75_p3) }
  0x19   : > { %v236_v2 = vld [vmem:[%s196_s10 + $0x20] sm:$0xff]  ;;  %233 = vst [vmem:[%s191_s11] sm:$0xff] %v232_v0  ;;  %235 = vst [vmem:[%s191_s11 + $0x8] sm:$0xff] %v234_v1  ;;  %v238_v3 = vld [vmem:[%s196_s10 + $0x30] sm:$0xff] }
  0x1a   : > { %237 = vst [vmem:[%s191_s11 + $0x10] sm:$0xff] %v236_v2  ;;  %v240_v4 = vld [vmem:[%s196_s10 + $0x40] sm:$0xff]  ;;  %239 = vst [vmem:[%s191_s11 + $0x18] sm:$0xff] %v238_v3 }
  0x1b   : > { %241 = vst [vmem:[%s191_s11 + $0x20] sm:$0xff] %v240_v4 }
  0x1c PF: > { %p576_p7 = scmp.ge.s32.totalorder %s729_s21, 1  ;;  %p246_p8 = scmp.lt.s32.totalorder %s729_s21, 5 }
  0x1e   : > { %p247_p9 = pnand %p576_p7, %p246_p8 }
  0x1f   : > { %s253_s12 = sand.u32 (!%p247_p9), 1, %s705_s15   ;;  %p292_p10 = scmp.lt.s32.totalorder (!%p247_p9), %s713_s17, 1 }
  0x20   : > { %250 = sbr.rel (%p247_p9) target bundleno = 424 (0x1a8), region = 62  ;;  %p294_p11 = scmp.lt.s32.totalorder (!%p247_p9), %s717_s18, 1 }
  0x21   : > { %s614_s13 = smul.u32 (!%p247_p9), 40, %s253_s12  ;;  %p309_p12 = scmp.eq.s32.totalorder (!%p247_p9), %s713_s17, 0 }
  0x27   : > { %s293_s14 = scalar_select %p292_p10, %s713_s17, 1 }
  0x28   : > { %s889_s18 = smov (!%p294_p11, %s717_s18), 1  ;;  %s255_s17 = scalar_lea.vmem [#allocation2], %s614_s13  ;;  %v731_v5 = vmov (%p309_p12), 0.0  }
  0x29   : > { %s577_s24 = sshll.u32 %s293_s14, 1  ;;  %s579_s26 = sshll.u32 %s889_s18, 3 }
  0x2a   : > { %s297_s25 = sadd.s32 %s577_s24, %s889_s18  ;;  %s831_s5 = scalar_lea.vmem %s874_s3, %s579_s26 }
  0x2b   : > { %s578_s27 = sshll.u32 %s297_s25, 3  ;;  %s839_s10 = scalar_lea.vmem %s875_s4, %s579_s26  ;;  %315 = vst [vmem:[%s831_s5] sm:$0xff] (%p309_p12), %v731_v5 }
  0x2c   : > { %s299_s8 = scalar_lea.vmem %s873_s2, %s578_s27  ;;  %314 = sbr.rel (!%p309_p12) target bundleno = 51 (0x33), region = 70  ;;  %316 = vst [vmem:[%s839_s10] sm:$0xff] (%p309_p12), %v731_v5 }
  0x33 PF: > { %v318_v6 = vld [vmem:[%s255_s17] sm:$0xff]  ;;  %v319_v7 = vld [vmem:[%s255_s17 + $0x8] sm:$0xff]  ;;  %v320_v8 = vld [vmem:[%s255_s17 + $0x10] sm:$0xff]  ;;  %v732_v9 = vmov 0.0|0.0   ;;  %vm733_vm0 = vmmov 0   ;;  %v734_v12 = vmov 0.0  }
  0x34   : > { %606 = vmatprep.subr.bf16.mxu0 %v732_v9  ;;  %v607_v10 = vpack.c.bf16 %v319_v7, %v318_v6  ;;  %v321_v11 = vld [vmem:[%s255_s17 + $0x18] sm:$0xff]  ;;  %603 = vmatprep.mubr.msk.f32.mxu0 %vm733_vm0, %v734_v12  ;;  %v322_v14 = vld [vmem:[%s255_s17 + $0x20] sm:$0xf]  ;;  %vm327_vm1 = vcmask 1043456   ;;  %vm323_vm2 = vcmask 293888  }
  0x35   : > { %v610_v13 = vpack.c.bf16 %v321_v11, %v320_v8  ;;  %v317_v15 = vld [vmem:[%s871_s0] sm:$0xff] }
  0x36   : > { %608 = vmatpush3.bf16.msra.mxu0 %v607_v10  ;;  %v402_v19 = vld [vmem:[%s831_s5] sm:$0xff] }
  0x37   : > { %609 = vmatprep.subr.bf16.mxu0 %v732_v9  ;;  %v407_v22 = vld [vmem:[%s839_s10] sm:$0xff] }
  0x3a   : > { %611 = vmatpush3.bf16.msra.mxu0 %v610_v13 }
  0x3b   : > { %601 = vmatprep.subr.mxu0 %v734_v12 }
  0x3e   : > { %602 = vmatpush3.msk.msra.mxu0 %vm327_vm1, %v322_v14 }
  0x3f   : > { %604 = vmatmul.mubr.msk.f32.vlgmr.msra.gmra.mrb[0].mxu0 %vm323_vm2, %v317_v15 }
 0x112   : > { %v397_v16 = vpop.f32.mrb[0].mxu0 }
 0x113   : > { %401 = vst [vmem:[%s299_s8] sm:$0xff] %v397_v16  ;;  %403 = vadd.xlane.f32.xlu0 %v397_v16  ;;  %v605_v17 = vpop.f32.mrb[1].mxu0  ;;  %v408_v18 = vmul.f32 %v397_v16, %v397_v16 }
 0x117   : > { %409 = vadd.xlane.f32.xlu0 %v408_v18 }
 0x1a0   : > { %v404_v20 = vpop.xlane.xlu0 %403 }
 0x1a1   : > { %v405_v21 = vadd.f32 %v404_v20, %v402_v19 }
 0x1a3   : > { %406 = vst [vmem:[%s831_s5] sm:$0xff] %v405_v21 }
 0x1a4   : > { %v410_v23 = vpop.xlane.xlu0 %409 }
 0x1a5   : > { %v411_v24 = vadd.f32 %v410_v23, %v407_v22 }
 0x1a7   : > { %412 = vst [vmem:[%s839_s10] sm:$0xff] %v411_v24 }
 0x1a8 PF: > { %s15_s21 = sadd.s32 1, %s729_s21   ;;  %s876_s15 = smov %s709_s16 }
 0x1a9   : > { %p12_p13 = scmp.ge.s32.totalorder %s15_s21, 6   ;;  %s877_s16 = smov %s811_s28 }
 0x1aa   : > { %s878_s17 = smov %s721_s19  ;;  %s879_s18 = smov %s725_s20 }
 0x1ab   : > { %s880_s19 = smov %s883_s22  ;;  %s881_s20 = smov %s887_s23 }
 0x1ac   :  { %14 = sbr.rel (!%p12_p13) target bundleno = 4 (0x4), region = 129 }

// kernel: conv_block_forward.3
= control target key start
LH: loop header
LB: loop body
LE: loop exit
PB: predicated region body
PF: predicated region fallthrough
CT: control target
= control target key end

     0   :  { %s403_s12 = smov 0   ;;  %s405_s13 = smov 0   ;;  %s442_s0 = inlined_call_operand.vmem [shape: f32[8,128], index: 0, kind: input, shape index: {}]   ;;  %s443_s1 = inlined_call_operand.vmem [shape: f32[8,128], index: 1, kind: input, shape index: {}]   ;;  %s444_s2 = inlined_call_operand.vmem [shape: f32[2,8,256], index: 2, kind: input, shape index: {}]   ;;  %s445_s3 = inlined_call_operand.vmem [shape: f32[2,8,256], index: 3, kind: output, shape index: {}]  }
   0x1   :  { %s407_s14 = smov 0  }
   0x2 LB: > { %s25_s15 = sadd.s32 1, %s376_s13  ;;  %p323_p0 = scmp.ge.s32.totalorder %s380_s14, 1  ;;  %s380_s14 = sphi %s407_s14, %s13_s14   ;;  %s376_s13 = sphi %s405_s13, %s447_s13   ;;  %s372_s12 = sphi %s403_s12, %s446_s12  }
   0x3   : > { %p27_p1 = scmp.ge.s32.totalorder %s25_s15, 2  ;;  %p158_p2 = scmp.lt.s32.totalorder %s380_s14, 3 }
   0x5   : > { %s449_s15 = smov (%p27_p1, %s25_s15), 0  ;;  %p159_p3 = pnand %p323_p0, %p158_p2 }
   0x6   : > { %v212_v0 = vld [vmem:[%s442_s0] sm:$0xff] (!%p159_p3)  ;;  %v382_v1 = vmov (!%p159_p3), 0   ;;  %p191_p4 = scmp.lt.s32.totalorder (!%p159_p3), %s372_s12, 1 }
   0x7   : > { %162 = sbr.rel (%p159_p3) target bundleno = 145 (0x91), region = 32  ;;  %357 = vset.pattern.permute.xlu0 (!%p159_p3), %v382_v1  ;;  %v213_v2 = vld [vmem:[%s443_s1] sm:$0xff] (!%p159_p3) }
   0x8   : > { %216 = vperm.xlu0 (!%p159_p3), %357, %v212_v0  }
   0xc   : > { %223 = vperm.xlu0 (!%p159_p3), %357, %v213_v2  }
   0xe   : > { %s451_s12 = smov (!%p191_p4, %s372_s12), 1 }
   0xf   : > { %s330_s20 = sshll.u32 %s451_s12, 4 }
  0x10   : > { %s198_s23 = scalar_lea.vmem %s444_s2, %s330_s20  ;;  %s208_s26 = scalar_lea.vmem %s445_s3, %s330_s20 }
  0x11   : > { %v210_v4 = vld [vmem:[%s198_s23] sm:$0xff]  ;;  %v211_v5 = vld [vmem:[%s198_s23 + $0x8] sm:$0xff] }
  0x87   : > { %v217_v3 = vpop.permute.xlu0 %216 }
  0x88   : > { %v219_v6 = vmul.f32 %v217_v3, %v210_v4  ;;  %v220_v7 = vmul.f32 %v217_v3, %v211_v5 }
  0x8b   : > { %v224_v8 = vpop.permute.xlu0 %223 }
  0x8c   : > { %v226_v9 = vadd.f32 %v224_v8, %v219_v6  ;;  %v227_v10 = vadd.f32 %v224_v8, %v220_v7 }
  0x8e   : > { %v228_v11 = vmax.f32 %v226_v9, 0.0  ;;  %v229_v12 = vmax.f32 %v227_v10, 0.0 }
  0x90   : > { %230 = vst [vmem:[%s208_s26] sm:$0xff] %v228_v11  ;;  %231 = vst [vmem:[%s208_s26 + $0x8] sm:$0xff] %v229_v12 }
  0x91 PF: > { %s13_s14 = sadd.s32 1, %s380_s14   ;;  %s446_s12 = smov %s376_s13 }
  0x92   : > { %p10_p5 = scmp.ge.s32.totalorder %s13_s14, 4   ;;  %s447_s13 = smov %s449_s15 }
  0x94   :  { %12 = sbr.rel (!%p10_p5) target bundleno = 2 (0x2), region = 62 }

</bundles_post_ra>
